<compile_context>
chip_gen: v7x
topology: tpu7x:2x2x1
jax: 0.10.0
libtpu: 0.0.40
codegen_flags: <defaults>
</compile_context>

<pallas_src>
import jax
import jax.numpy as jnp
from jax.experimental import pallas as pl
from jax.experimental.pallas import tpu as pltpu

D_IN = 300   # input / recon features
D_H = 100    # hidden features (fc1 / fc3 output)
D_Z = 20     # latent dim
D_HP = 128   # hidden padded to one full lane group
D_MP = 128   # fused mu||logvar slab width (2*D_Z = 40, padded to 128 lanes)


def _vae_kernel(
    x_ref, eps_ref,
    w1_ref, b1_ref,
    w2_ref, b2_ref,      # fused fc21|fc22, padded to [D_HP, D_MP]
    w3_ref, b3_ref,
    w4_ref, b4_ref,
    recon_ref, slab_ref,
):
    x = x_ref[...]                                                     # [TB, 300]

    # encode: fc1 + relu (output padded to 128 lanes, pad lanes are exactly 0)
    h1 = jnp.dot(x, w1_ref[...], preferred_element_type=jnp.float32) + b1_ref[...]
    h1 = jnp.maximum(h1, 0.0)                                          # [TB, 128]

    # fused fc21/fc22: lanes [0:20] = mu, [20:40] = logvar, rest exactly 0.
    slab = jnp.dot(h1, w2_ref[...], preferred_element_type=jnp.float32) + b2_ref[...]
    mu = slab[:, :D_Z]                                                 # [TB, 20]
    logvar = slab[:, D_Z:2 * D_Z]                                      # [TB, 20]

    # reparametrize: std = exp(1e-5 * logvar); z = eps * std + mu  (exp -> EUP slot)
    std = jnp.exp(logvar * 1e-5)
    z = eps_ref[...] * std + mu                                        # [TB, 20]

    # decode: fc3 + relu, fc4 + sigmoid
    h3 = jnp.dot(z, w3_ref[...], preferred_element_type=jnp.float32) + b3_ref[...]
    h3 = jnp.maximum(h3, 0.0)                                          # [TB, 128]
    logits = jnp.dot(h3, w4_ref[...], preferred_element_type=jnp.float32) + b4_ref[...]

    recon_ref[...] = jax.nn.sigmoid(logits)                            # [TB, 300]
    slab_ref[...] = slab                                               # [TB, 128] lane-dense


def vae_forward(x, params, eps, *, block_b=512):
    """x: [B, 300] f32, eps: [B, 20] f32. Returns (recon [B,300], mu [B,20], logvar [B,20])."""
    B = x.shape[0]
    # block_b must be a multiple of 8 (sublanes); if B < block_b the block spans the
    # full batch dim, which is always legal.
    TB = min(block_b, B)
    grid = (pl.cdiv(B, TB),)

    def tiled(shape):
        return pl.BlockSpec(shape, lambda i: (i, 0))

    def resident(arr):
        return pl.BlockSpec(arr.shape, lambda i: (0, 0))

    w_args = (
        params["w1"], params["b1"],
        params["w2"], params["b2"],
        params["w3"], params["b3"],
        params["w4"], params["b4"],
    )

    recon, slab = pl.pallas_call(
        _vae_kernel,
        grid=grid,
        in_specs=[tiled((TB, D_IN)), tiled((TB, D_Z))] + [resident(a) for a in w_args],
        out_specs=(tiled((TB, D_IN)), tiled((TB, D_MP))),
        out_shape=(
            jax.ShapeDtypeStruct((B, D_IN), jnp.float32),   # recon
            jax.ShapeDtypeStruct((B, D_MP), jnp.float32),   # mu || logvar slab
        ),
        compiler_params=pltpu.CompilerParams(dimension_semantics=("parallel",)),
    )(x, eps, *w_args)

    mu = slab[:, :D_Z]
    logvar = slab[:, D_Z:2 * D_Z]
    return recon, mu, logvar


def init_raw_params(key):
    """Unpadded parameters with nn.Linear-default init (weights stored transposed)."""
    ks = jax.random.split(key, 10)

    def linear(kw, kb, fan_in, fan_out):
        bound = 1.0 / jnp.sqrt(jnp.float32(fan_in))
        w = jax.random.uniform(kw, (fan_in, fan_out), jnp.float32, -bound, bound)
        b = jax.random.uniform(kb, (1, fan_out), jnp.float32, -bound, bound)
        return w, b

    w1, b1 = linear(ks[0], ks[1], D_IN, D_H)
    w21, b21 = linear(ks[2], ks[3], D_H, D_Z)
    w22, b22 = linear(ks[4], ks[5], D_H, D_Z)
    w3, b3 = linear(ks[6], ks[7], D_Z, D_H)
    w4, b4 = linear(ks[8], ks[9], D_H, D_IN)
    return {
        "w1": w1, "b1": b1,
        "w21": w21, "b21": b21,
        "w22": w22, "b22": b22,
        "w3": w3, "b3": b3,
        "w4": w4, "b4": b4,
    }


def pack_params(raw):
    """One-time (init-time) padding/fusion into the kernel's lane-aligned layout."""

    def pad_to(a, shape):
        return jnp.pad(a, [(0, t - s) for s, t in zip(a.shape, shape)])

    # fc1: [300, 100] -> [300, 128]
    w1 = pad_to(raw["w1"], (D_IN, D_HP))
    b1 = pad_to(raw["b1"], (1, D_HP))
    # fused fc21|fc22: [100, 20] ++ [100, 20] -> [128, 128]
    w2 = pad_to(jnp.concatenate([raw["w21"], raw["w22"]], axis=1), (D_HP, D_MP))
    b2 = pad_to(jnp.concatenate([raw["b21"], raw["b22"]], axis=1), (1, D_MP))
    # fc3: [20, 100] -> [20, 128]
    w3 = pad_to(raw["w3"], (D_Z, D_HP))
    b3 = pad_to(raw["b3"], (1, D_HP))
    # fc4: [100, 300] -> [128, 300]
    w4 = pad_to(raw["w4"], (D_HP, D_IN))
    b4 = raw["b4"]
    return {"w1": w1, "b1": b1, "w2": w2, "b2": b2,
            "w3": w3, "b3": b3, "w4": w4, "b4": b4}


def _reference(x, raw, eps):
    """Pure-JAX reference on the ORIGINAL (unpadded, unfused) parameters."""
    h1 = jnp.maximum(x @ raw["w1"] + raw["b1"], 0.0)
    mu = h1 @ raw["w21"] + raw["b21"]
    logvar = h1 @ raw["w22"] + raw["b22"]
    std = jnp.exp(logvar * 1e-5)
    z = eps * std + mu
    h3 = jnp.maximum(z @ raw["w3"] + raw["b3"], 0.0)
    recon = jax.nn.sigmoid(h3 @ raw["w4"] + raw["b4"])
    return recon, mu, logvar


if __name__ == "__main__":
    key = jax.random.PRNGKey(0)
    k_param, k_x, k_eps = jax.random.split(key, 3)

    B = 8
    raw = init_raw_params(k_param)
    packed = pack_params(raw)
    x = jax.random.normal(k_x, (B, D_IN), jnp.float32)
    # eps ~ N(0, 1), generated deterministically in JAX (replaces torch .normal_()).
    eps = jax.random.normal(k_eps, (B, D_Z), jnp.float32)

    recon, mu, logvar = jax.block_until_ready(vae_forward(x, packed, eps))

    r_recon, r_mu, r_logvar = _reference(x, raw, eps)
    assert recon.shape == (B, D_IN) and mu.shape == (B, D_Z) and logvar.shape == (B, D_Z)
    assert jnp.allclose(recon, r_recon, atol=1e-5)
    assert jnp.allclose(mu, r_mu, atol=1e-5)
    assert jnp.allclose(logvar, r_logvar, atol=1e-5)

    print("KERNEL_OK")
</pallas_src>

<mosaic_0001>
module attributes {stable_mosaic.version = 11 : i64} {
  func.func @_vae_kernel(%arg0: i32, %arg1: memref<8x300xf32, #tpu.memory_space<vmem>>, %arg2: memref<8x20xf32, #tpu.memory_space<vmem>>, %arg3: memref<300x128xf32, #tpu.memory_space<vmem>>, %arg4: memref<1x128xf32, #tpu.memory_space<vmem>>, %arg5: memref<128x128xf32, #tpu.memory_space<vmem>>, %arg6: memref<1x128xf32, #tpu.memory_space<vmem>>, %arg7: memref<20x128xf32, #tpu.memory_space<vmem>>, %arg8: memref<1x128xf32, #tpu.memory_space<vmem>>, %arg9: memref<128x300xf32, #tpu.memory_space<vmem>>, %arg10: memref<1x300xf32, #tpu.memory_space<vmem>>, %arg11: memref<8x300xf32, #tpu.memory_space<vmem>>, %arg12: memref<8x128xf32, #tpu.memory_space<vmem>>) attributes {dimension_semantics = [#tpu.dimension_semantics<parallel>], iteration_bounds = array<i64: 1>, scalar_prefetch = 0 : i64, scratch_operands = 0 : i64, tpu.core_type = #tpu.core_type<tc>, window_params = [{transform_indices = @transform_0, window_bounds = array<i64: 8, 300>}, {transform_indices = @transform_1, window_bounds = array<i64: 8, 20>}, {pipeline_mode = #tpu.pipeline_mode<synchronous>, transform_indices = @transform_2, window_bounds = array<i64: 300, 128>}, {pipeline_mode = #tpu.pipeline_mode<synchronous>, transform_indices = @transform_3, window_bounds = array<i64: 1, 128>}, {pipeline_mode = #tpu.pipeline_mode<synchronous>, transform_indices = @transform_4, window_bounds = array<i64: 128, 128>}, {pipeline_mode = #tpu.pipeline_mode<synchronous>, transform_indices = @transform_5, window_bounds = array<i64: 1, 128>}, {pipeline_mode = #tpu.pipeline_mode<synchronous>, transform_indices = @transform_6, window_bounds = array<i64: 20, 128>}, {pipeline_mode = #tpu.pipeline_mode<synchronous>, transform_indices = @transform_7, window_bounds = array<i64: 1, 128>}, {pipeline_mode = #tpu.pipeline_mode<synchronous>, transform_indices = @transform_8, window_bounds = array<i64: 128, 300>}, {pipeline_mode = #tpu.pipeline_mode<synchronous>, transform_indices = @transform_9, window_bounds = array<i64: 1, 300>}, {transform_indices = @transform_10, window_bounds = array<i64: 8, 300>}, {transform_indices = @transform_11, window_bounds = array<i64: 8, 128>}]} {
    %c0 = arith.constant 0 : index
    %c0_0 = arith.constant 0 : index
    %0 = vector.load %arg1[%c0, %c0_0] : memref<8x300xf32, #tpu.memory_space<vmem>>, vector<8x300xf32>
    %c0_1 = arith.constant 0 : index
    %c0_2 = arith.constant 0 : index
    %1 = vector.load %arg3[%c0_1, %c0_2] : memref<300x128xf32, #tpu.memory_space<vmem>>, vector<300x128xf32>
    %cst = arith.constant dense<0.000000e+00> : vector<8x128xf32>
    %2 = tpu.matmul %0, %1, %cst {dimension_numbers = #tpu.dot_dimension_numbers<[1], [0], [0], [1], [0, 0, 1, 1], [], []>} : vector<8x300xf32>, vector<300x128xf32>, vector<8x128xf32> -> vector<8x128xf32>
    %c0_3 = arith.constant 0 : index
    %c0_4 = arith.constant 0 : index
    %3 = vector.load %arg4[%c0_3, %c0_4] : memref<1x128xf32, #tpu.memory_space<vmem>>, vector<1x128xf32>
    %4 = vector.broadcast %3 : vector<1x128xf32> to vector<8x128xf32>
    %5 = arith.addf %2, %4 : vector<8x128xf32>
    %cst_5 = arith.constant 0.000000e+00 : f32
    %6 = vector.broadcast %cst_5 : f32 to vector<8x128xf32>
    %7 = arith.maximumf %5, %6 : vector<8x128xf32>
    %c0_6 = arith.constant 0 : index
    %c0_7 = arith.constant 0 : index
    %8 = vector.load %arg5[%c0_6, %c0_7] : memref<128x128xf32, #tpu.memory_space<vmem>>, vector<128x128xf32>
    %cst_8 = arith.constant dense<0.000000e+00> : vector<8x128xf32>
    %9 = tpu.matmul %7, %8, %cst_8 {dimension_numbers = #tpu.dot_dimension_numbers<[1], [0], [0], [1], [0, 0, 1, 1], [], []>} : vector<8x128xf32>, vector<128x128xf32>, vector<8x128xf32> -> vector<8x128xf32>
    %c0_9 = arith.constant 0 : index
    %c0_10 = arith.constant 0 : index
    %10 = vector.load %arg6[%c0_9, %c0_10] : memref<1x128xf32, #tpu.memory_space<vmem>>, vector<1x128xf32>
    %11 = vector.broadcast %10 : vector<1x128xf32> to vector<8x128xf32>
    %12 = arith.addf %9, %11 : vector<8x128xf32>
    %13 = vector.extract_strided_slice %12 {offsets = [0, 0], sizes = [8, 20], strides = [1, 1]} : vector<8x128xf32> to vector<8x20xf32>
    %14 = vector.extract_strided_slice %12 {offsets = [0, 20], sizes = [8, 20], strides = [1, 1]} : vector<8x128xf32> to vector<8x20xf32>
    %cst_11 = arith.constant 9.99999974E-6 : f32
    %15 = vector.broadcast %cst_11 : f32 to vector<8x20xf32>
    %16 = arith.mulf %14, %15 : vector<8x20xf32>
    %17 = math.exp %16 : vector<8x20xf32>
    %c0_12 = arith.constant 0 : index
    %c0_13 = arith.constant 0 : index
    %18 = vector.load %arg2[%c0_12, %c0_13] : memref<8x20xf32, #tpu.memory_space<vmem>>, vector<8x20xf32>
    %19 = arith.mulf %18, %17 : vector<8x20xf32>
    %20 = arith.addf %19, %13 : vector<8x20xf32>
    %c0_14 = arith.constant 0 : index
    %c0_15 = arith.constant 0 : index
    %21 = vector.load %arg7[%c0_14, %c0_15] : memref<20x128xf32, #tpu.memory_space<vmem>>, vector<20x128xf32>
    %cst_16 = arith.constant dense<0.000000e+00> : vector<8x128xf32>
    %22 = tpu.matmul %20, %21, %cst_16 {dimension_numbers = #tpu.dot_dimension_numbers<[1], [0], [0], [1], [0, 0, 1, 1], [], []>} : vector<8x20xf32>, vector<20x128xf32>, vector<8x128xf32> -> vector<8x128xf32>
    %c0_17 = arith.constant 0 : index
    %c0_18 = arith.constant 0 : index
    %23 = vector.load %arg8[%c0_17, %c0_18] : memref<1x128xf32, #tpu.memory_space<vmem>>, vector<1x128xf32>
    %24 = vector.broadcast %23 : vector<1x128xf32> to vector<8x128xf32>
    %25 = arith.addf %22, %24 : vector<8x128xf32>
    %cst_19 = arith.constant 0.000000e+00 : f32
    %26 = vector.broadcast %cst_19 : f32 to vector<8x128xf32>
    %27 = arith.maximumf %25, %26 : vector<8x128xf32>
    %c0_20 = arith.constant 0 : index
    %c0_21 = arith.constant 0 : index
    %28 = vector.load %arg9[%c0_20, %c0_21] : memref<128x300xf32, #tpu.memory_space<vmem>>, vector<128x300xf32>
    %cst_22 = arith.constant dense<0.000000e+00> : vector<8x300xf32>
    %29 = tpu.matmul %27, %28, %cst_22 {dimension_numbers = #tpu.dot_dimension_numbers<[1], [0], [0], [1], [0, 0, 1, 1], [], []>} : vector<8x128xf32>, vector<128x300xf32>, vector<8x300xf32> -> vector<8x300xf32>
    %c0_23 = arith.constant 0 : index
    %c0_24 = arith.constant 0 : index
    %30 = vector.load %arg10[%c0_23, %c0_24] : memref<1x300xf32, #tpu.memory_space<vmem>>, vector<1x300xf32>
    %31 = vector.broadcast %30 : vector<1x300xf32> to vector<8x300xf32>
    %32 = arith.addf %29, %31 : vector<8x300xf32>
    %33 = arith.negf %32 : vector<8x300xf32>
    %34 = math.exp %33 : vector<8x300xf32>
    %cst_25 = arith.constant 1.000000e+00 : f32
    %35 = vector.broadcast %cst_25 : f32 to vector<8x300xf32>
    %36 = arith.addf %35, %34 : vector<8x300xf32>
    %37 = arith.divf %35, %36 : vector<8x300xf32>
    %c0_26 = arith.constant 0 : index
    %c0_27 = arith.constant 0 : index
    %38 = vector.load %arg11[%c0_26, %c0_27] : memref<8x300xf32, #tpu.memory_space<vmem>>, vector<8x300xf32>
    tpu.vector_store %arg11[%c0_26, %c0_27], %37 {strides = array<i32>} : memref<8x300xf32, #tpu.memory_space<vmem>>, vector<8x300xf32>,
    %c0_28 = arith.constant 0 : index
    %c0_29 = arith.constant 0 : index
    %39 = vector.load %arg12[%c0_28, %c0_29] : memref<8x128xf32, #tpu.memory_space<vmem>>, vector<8x128xf32>
    tpu.vector_store %arg12[%c0_28, %c0_29], %12 {strides = array<i32>} : memref<8x128xf32, #tpu.memory_space<vmem>>, vector<8x128xf32>,
    return
  }
  func.func @transform_0(%arg0: i32) -> (i32, i32) {
    %c0_i32 = arith.constant 0 : i32
    %c0_i32_0 = arith.constant 0 : i32
    return %arg0, %c0_i32 : i32, i32
  }
  func.func @transform_1(%arg0: i32) -> (i32, i32) {
    %c0_i32 = arith.constant 0 : i32
    %c0_i32_0 = arith.constant 0 : i32
    return %arg0, %c0_i32 : i32, i32
  }
  func.func @transform_2(%arg0: i32) -> (i32, i32) {
    %c0_i32 = arith.constant 0 : i32
    %c0_i32_0 = arith.constant 0 : i32
    %c0_i32_1 = arith.constant 0 : i32
    return %c0_i32, %c0_i32_0 : i32, i32
  }
  func.func @transform_3(%arg0: i32) -> (i32, i32) {
    %c0_i32 = arith.constant 0 : i32
    %c0_i32_0 = arith.constant 0 : i32
    %c0_i32_1 = arith.constant 0 : i32
    return %c0_i32, %c0_i32_0 : i32, i32
  }
  func.func @transform_4(%arg0: i32) -> (i32, i32) {
    %c0_i32 = arith.constant 0 : i32
    %c0_i32_0 = arith.constant 0 : i32
    %c0_i32_1 = arith.constant 0 : i32
    return %c0_i32, %c0_i32_0 : i32, i32
  }
  func.func @transform_5(%arg0: i32) -> (i32, i32) {
    %c0_i32 = arith.constant 0 : i32
    %c0_i32_0 = arith.constant 0 : i32
    %c0_i32_1 = arith.constant 0 : i32
    return %c0_i32, %c0_i32_0 : i32, i32
  }
  func.func @transform_6(%arg0: i32) -> (i32, i32) {
    %c0_i32 = arith.constant 0 : i32
    %c0_i32_0 = arith.constant 0 : i32
    %c0_i32_1 = arith.constant 0 : i32
    return %c0_i32, %c0_i32_0 : i32, i32
  }
  func.func @transform_7(%arg0: i32) -> (i32, i32) {
    %c0_i32 = arith.constant 0 : i32
    %c0_i32_0 = arith.constant 0 : i32
    %c0_i32_1 = arith.constant 0 : i32
    return %c0_i32, %c0_i32_0 : i32, i32
  }
  func.func @transform_8(%arg0: i32) -> (i32, i32) {
    %c0_i32 = arith.constant 0 : i32
    %c0_i32_0 = arith.constant 0 : i32
    %c0_i32_1 = arith.constant 0 : i32
    return %c0_i32, %c0_i32_0 : i32, i32
  }
  func.func @transform_9(%arg0: i32) -> (i32, i32) {
    %c0_i32 = arith.constant 0 : i32
    %c0_i32_0 = arith.constant 0 : i32
    %c0_i32_1 = arith.constant 0 : i32
    return %c0_i32, %c0_i32_0 : i32, i32
  }
  func.func @transform_10(%arg0: i32) -> (i32, i32) {
    %c0_i32 = arith.constant 0 : i32
    %c0_i32_0 = arith.constant 0 : i32
    return %arg0, %c0_i32 : i32, i32
  }
  func.func @transform_11(%arg0: i32) -> (i32, i32) {
    %c0_i32 = arith.constant 0 : i32
    %c0_i32_0 = arith.constant 0 : i32
    return %arg0, %c0_i32 : i32, i32
  }
}

</mosaic_0001>

<bundles_post_ra>
// kernel: tpu_custom_call.1
= control target key start
LH: loop header
LB: loop body
LE: loop exit
PB: predicated region body
PF: predicated region fallthrough
CT: control target
= control target key end

     0   :  { %17 = vsyncpa [#allocation3], 0  ;;  %v1061_v7 = vmov 0.0|0.0   ;;  %vm1062_vm0 = vmmov 0   ;;  %v1063_v13 = vmov 0.0   ;;  %vm91_vm1 = vcmask 1043456   ;;  %s1525_s0 = inlined_call_operand.vmem [shape: f32[8,300], index: 0, kind: input, shape index: {}]   ;;  %s1526_s1 = inlined_call_operand.vmem [shape: f32[8,20], index: 1, kind: input, shape index: {}]   ;;  %s1527_s2 = inlined_call_operand.vmem [shape: f32[300,128], index: 2, kind: input, shape index: {}]   ;;  %s1528_s3 = inlined_call_operand.vmem [shape: f32[1,128], index: 3, kind: input, shape index: {}]   ;;  %s1529_s4 = inlined_call_operand.vmem [shape: f32[128,128], index: 4, kind: input, shape index: {}]   ;;  %s1530_s5 = inlined_call_operand.vmem [shape: f32[1,128], index: 5, kind: input, shape index: {}]   ;;  %s1531_s6 = inlined_call_operand.vmem [shape: f32[20,128], index: 6, kind: input, shape index: {}]   ;;  %s1532_s7 = inlined_call_operand.vmem [shape: f32[1,128], index: 7, kind: input, shape index: {}]   ;;  %s1533_s8 = inlined_call_operand.vmem [shape: f32[128,300], index: 8, kind: input, shape index: {}]   ;;  %s1534_s9 = inlined_call_operand.vmem [shape: f32[1,300], index: 9, kind: input, shape index: {}]   ;;  %s1535_s10 = inlined_call_operand.hbm [shape: f32[8,300], index: 10, kind: output, shape index: {0}]   ;;  %s1536_s11 = inlined_call_operand.hbm [shape: f32[8,128], index: 11, kind: output, shape index: {1}]  }
   0x1   :  { %v58_v0 = vld [vmem:[%s1527_s2 + $0x80] sm:$0xff]  ;;  %v59_v1 = vld [vmem:[%s1527_s2 + $0x88] sm:$0xff]  ;;  %v60_v5 = vld [vmem:[%s1527_s2 + $0x90] sm:$0xff]  ;;  %899 = vmatprep.subr.bf16.mxu1 %v1061_v7  ;;  %785 = vmatprep.mubr.msk.f32.mxu1 %vm1062_vm0, %v1063_v13  ;;  %vm1064_vm2 = vmmov 1  }
   0x2   :  { %v42_v2 = vld [vmem:[%s1527_s2] sm:$0xff]  ;;  %v867_v3 = vpack.c.bf16 %v59_v1, %v58_v0  ;;  %v43_v4 = vld [vmem:[%s1527_s2 + $0x8] sm:$0xff]  ;;  %v61_v6 = vld [vmem:[%s1527_s2 + $0x98] sm:$0xff] }
   0x3   :  { %v869_v8 = vpack.c.bf16 %v43_v4, %v42_v2  ;;  %v871_v9 = vpack.c.bf16 %v61_v6, %v60_v5  ;;  %v44_v10 = vld [vmem:[%s1527_s2 + $0x10] sm:$0xff]  ;;  %v45_v11 = vld [vmem:[%s1527_s2 + $0x18] sm:$0xff]  ;;  %v62_v12 = vld [vmem:[%s1527_s2 + $0xa0] sm:$0xff] }
   0x4   :  { %868 = vmatprep.subr.bf16.mxu0 %v867_v3  ;;  %v63_v14 = vld [vmem:[%s1527_s2 + $0xa8] sm:$0xff]  ;;  %v873_v15 = vpack.c.bf16 %v45_v11, %v44_v10  ;;  %v46_v17 = vld [vmem:[%s1527_s2 + $0x20] sm:$0xff]  ;;  %v64_v19 = vld [vmem:[%s1527_s2 + $0xb0] sm:$0xff] }
   0x5   :  { %870 = vmatpush3.bf16.msra.mxu0 %v869_v8  ;;  %v875_v16 = vpack.c.bf16 %v63_v14, %v62_v12  ;;  %v47_v18 = vld [vmem:[%s1527_s2 + $0x28] sm:$0xff]  ;;  %v65_v20 = vld [vmem:[%s1527_s2 + $0xb8] sm:$0xff]  ;;  %v48_v22 = vld [vmem:[%s1527_s2 + $0x30] sm:$0xff] }
   0x6   :  { %872 = vmatprep.subr.bf16.mxu0 %v871_v9  ;;  %v877_v21 = vpack.c.bf16 %v47_v18, %v46_v17  ;;  %v879_v23 = vpack.c.bf16 %v65_v20, %v64_v19  ;;  %v49_v24 = vld [vmem:[%s1527_s2 + $0x38] sm:$0xff]  ;;  %v74_v25 = vld [vmem:[%s1527_s2 + $0x100] sm:$0xff]  ;;  %v75_v26 = vld [vmem:[%s1527_s2 + $0x108] sm:$0xff] }
   0x7   :  { %v66_v27 = vld [vmem:[%s1527_s2 + $0xc0] sm:$0xff]  ;;  %v67_v28 = vld [vmem:[%s1527_s2 + $0xc8] sm:$0xff]  ;;  %v900_v29 = vpack.c.bf16 %v75_v26, %v74_v25  ;;  %v76_v30 = vld [vmem:[%s1527_s2 + $0x110] sm:$0xff]  ;;  %v881_v32 = vpack.c.bf16 %v49_v24, %v48_v22 }
   0x8   :  { %v77_v31 = vld [vmem:[%s1527_s2 + $0x118] sm:$0xff]  ;;  %v50_v33 = vld [vmem:[%s1527_s2 + $0x40] sm:$0xff]  ;;  %v40_v35 = vld [vmem:[%s1525_s0 + $0x8] sm:$0xff]  ;;  %v883_v36 = vpack.c.bf16 %v67_v28, %v66_v27 }
   0x9   :  { %874 = vmatpush3.bf16.msra.mxu0 %v873_v15  ;;  %901 = vmatpush3.bf16.msra.mxu1 %v900_v29  ;;  %v903_v34 = vpack.c.bf16 %v77_v31, %v76_v30  ;;  %v51_v37 = vld [vmem:[%s1527_s2 + $0x48] sm:$0xff]  ;;  %v78_v38 = vld [vmem:[%s1527_s2 + $0x120] sm:$0xff]  ;;  %v68_v40 = vld [vmem:[%s1527_s2 + $0xd0] sm:$0xff] }
   0xa   :  { %876 = vmatprep.subr.bf16.mxu0 %v875_v16  ;;  %902 = vmatprep.subr.bf16.mxu1 %v1061_v7  ;;  %v79_v39 = vld [vmem:[%s1527_s2 + $0x128] sm:$0xf]  ;;  %v69_v41 = vld [vmem:[%s1527_s2 + $0xd8] sm:$0xff]  ;;  %v885_v42 = vpack.c.bf16 %v51_v37, %v50_v33  ;;  %v52_v43 = vld [vmem:[%s1527_s2 + $0x50] sm:$0xff] }
   0xb   :  { %159 = vmatprep.mubr.f32.mxu0 %v40_v35  ;;  %v53_v44 = vld [vmem:[%s1527_s2 + $0x58] sm:$0xff]  ;;  %v906_v45 = vpack.c.bf16 %v79_v39, %v78_v38  ;;  %v887_v46 = vpack.c.bf16 %v69_v41, %v68_v40  ;;  %vm907_vm3 = vmpackc.low %vm91_vm1, %vm1064_vm2  ;;  %v236_v47 = vld [vmem:[%s1529_s4] sm:$0xff] }
   0xc   :  { %v237_v48 = vld [vmem:[%s1529_s4 + $0x8] sm:$0xff]  ;;  %v70_v49 = vld [vmem:[%s1527_s2 + $0xe0] sm:$0xff] }
   0xd   :  { %878 = vmatpush3.bf16.msra.mxu0 %v877_v21  ;;  %904 = vmatpush3.bf16.msra.mxu1 %v903_v34  ;;  %v71_v50 = vld [vmem:[%s1527_s2 + $0xe8] sm:$0xff] }
   0xe   :  { %880 = vmatprep.subr.bf16.mxu0 %v879_v23  ;;  %905 = vmatprep.subr.bf16.mxu1 %v1061_v7 }
  0x11   :  { %882 = vmatpush3.bf16.msra.mxu0 %v881_v32 }
  0x12   :  { %884 = vmatprep.subr.bf16.mxu0 %v883_v36 }
  0x13   :  { %18 = vsyncpa [#allocation5], 0  ;;  %v889_v51 = vpack.c.bf16 %v53_v44, %v52_v43  ;;  %v54_v52 = vld [vmem:[%s1527_s2 + $0x60] sm:$0xff]  ;;  %908 = vmatpush3.bf16.msk.msra.mxu1 %vm907_vm3, %v906_v45  ;;  %v41_v53 = vld [vmem:[%s1525_s0 + $0x10] sm:$0xff]  ;;  %vm87_vm4 = vcmask 359424   ;;  %v910_v54 = vpack.c.bf16 %v237_v48, %v236_v47  ;;  %v891_v55 = vpack.c.bf16 %v71_v50, %v70_v49  ;;  %s1065_s12 = smov 108  }
  0x14   :  { %v55_v56 = vld [vmem:[%s1527_s2 + $0x68] sm:$0xff]  ;;  %909 = vmatprep.subr.bf16.mxu1 %v1061_v7  ;;  %v238_v57 = vld [vmem:[%s1529_s4 + $0x10] sm:$0xff]  ;;  %v239_v58 = vld [vmem:[%s1529_s4 + $0x18] sm:$0xff]  ;;  %vm349_vm5 = vcmask 162816   ;;  %s1066_s20 = smov [#allocation4]  }
  0x15   :  { %886 = vmatpush3.bf16.msra.mxu0 %v885_v42  ;;  %v72_v59 = vld [vmem:[%s1527_s2 + $0xf0] sm:$0xff]  ;;  %v73_v60 = vld [vmem:[%s1527_s2 + $0xf8] sm:$0xff]  ;;  %v893_v61 = vpack.c.bf16 %v55_v56, %v54_v52  ;;  %v913_v63 = vpack.c.bf16 %v239_v58, %v238_v57  ;;  %v240_v2 = vld [vmem:[%s1529_s4 + $0x20] sm:$0xff]  ;;  %s671_s21 = sshll.u32 %s1066_s20, 4  ;;  %s672_s21 = int_to_ptr.vmem [resolvable:$true] %s671_s21 }
  0x16   :  { %888 = vmatprep.subr.bf16.mxu0 %v887_v46  ;;  %786 = vmatmul.mubr.msk.f32.vlgmr.msra.gmra.mrb[0].mxu1 %vm87_vm4, %v41_v53  ;;  %v56_v62 = vld [vmem:[%s1527_s2 + $0x70] sm:$0xff]  ;;  %v895_v0 = vpack.c.bf16 %v73_v60, %v72_v59  ;;  %v57_v1 = vld [vmem:[%s1527_s2 + $0x78] sm:$0xff]  ;;  %v241_v3 = vld [vmem:[%s1529_s4 + $0x28] sm:$0xff]  ;;  %s1013_s22 = scalar_lea.vmem %s672_s21, 128  ;;  %p1018_p1 = scmp.lt.s32.totalorder %s672_s21, %s672_s21 }
  0x17   :  { %911 = vmatpush3.bf16.msra.mxu1 %v910_v54  ;;  %820 = vmatprep.mubr.msk.f32.mxu1 %vm1062_vm0, %v1063_v13  ;;  %v897_v4 = vpack.c.bf16 %v57_v1, %v56_v62  ;;  %v916_v5 = vpack.c.bf16 %v241_v3, %v240_v2  ;;  %v242_v6 = vld [vmem:[%s1529_s4 + $0x30] sm:$0xff]  ;;  %v243_v8 = vld [vmem:[%s1529_s4 + $0x38] sm:$0xff]  ;;  %v39_v9 = vld [vmem:[%s1525_s0] sm:$0xff]  ;;  %p1014_p0 = scmp.ne.s32.totalorder %s672_s21, %s1013_s22  ;;  %p1019_p2 = scmp.lt.s32.totalorder %s1013_s22, %s1013_s22 }
  0x18   :  { %912 = vmatprep.subr.bf16.mxu1 %v1061_v7  ;;  %v919_v10 = vpack.c.bf16 %v243_v8, %v242_v6  ;;  %v244_v11 = vld [vmem:[%s1529_s4 + $0x40] sm:$0xff]  ;;  %v245_v12 = vld [vmem:[%s1529_s4 + $0x48] sm:$0xff]  ;;  %v246_v15 = vld [vmem:[%s1529_s4 + $0x50] sm:$0xff] }
  0x19   :  { %890 = vmatpush3.bf16.msra.mxu0 %v889_v51  ;;  %v922_v14 = vpack.c.bf16 %v245_v12, %v244_v11  ;;  %v247_v16 = vld [vmem:[%s1529_s4 + $0x58] sm:$0xff]  ;;  %v248_v18 = vld [vmem:[%s1529_s4 + $0x60] sm:$0xff]  ;;  %v249_v19 = vld [vmem:[%s1529_s4 + $0x68] sm:$0xff]  ;;  %p1020_p3 = por %p1019_p2, %p1018_p1 }
  0x1a   :  { %892 = vmatprep.subr.bf16.mxu0 %v891_v55  ;;  %v925_v17 = vpack.c.bf16 %v247_v16, %v246_v15  ;;  %v928_v20 = vpack.c.bf16 %v249_v19, %v248_v18  ;;  %v250_v21 = vld [vmem:[%s1529_s4 + $0x70] sm:$0xff]  ;;  %v251_v22 = vld [vmem:[%s1529_s4 + $0x78] sm:$0xff]  ;;  %v683_v28 = vld [vmem:[%s1528_s3] ss:$0 sm:$0xff] }
  0x1b   :  { %914 = vmatpush3.bf16.msra.mxu1 %v913_v63  ;;  %v931_v23 = vpack.c.bf16 %v251_v22, %v250_v21  ;;  %v339_v33 = vld [vmem:[%s1531_s6] sm:$0xff]  ;;  %v340_v34 = vld [vmem:[%s1531_s6 + $0x8] sm:$0xff]  ;;  %v341_v42 = vld [vmem:[%s1531_s6 + $0x10] sm:$0xf]  ;;  %p1021_p4 = pnand %p1020_p3, %p1014_p0 }
  0x1c   :  { %915 = vmatprep.subr.bf16.mxu1 %v1061_v7  ;;  %v934_v35 = vpack.c.bf16 %v340_v34, %v339_v33  ;;  %v686_v36 = vld [vmem:[%s1530_s5] ss:$0 sm:$0xff]  ;;  %v428_v43 = vld [vmem:[%s1533_s8 + $0x8] sm:$0xff]  ;;  %v429_v46 = vld [vmem:[%s1533_s8 + $0x10] sm:$0xff] }
  0x1d   :  { %894 = vmatpush3.bf16.msra.mxu0 %v893_v61  ;;  %v431_v44 = vld [vmem:[%s1533_s8 + $0x20] sm:$0xff]  ;;  %v432_v47 = vld [vmem:[%s1533_s8 + $0x28] sm:$0xff]  ;;  %v438_v50 = vld [vmem:[%s1533_s8 + $0x58] sm:$0xff] }
  0x1e   :  { %896 = vmatprep.subr.bf16.mxu0 %v895_v0  ;;  %v936_v45 = vpack.c.bf16 %v431_v44, %v428_v43  ;;  %v969_v48 = vpack.c.bf16 %v432_v47, %v429_v46  ;;  %v435_v49 = vld [vmem:[%s1533_s8 + $0x40] sm:$0xff]  ;;  %v441_v53 = vld [vmem:[%s1533_s8 + $0x70] sm:$0xff]  ;;  %v444_v54 = vld [vmem:[%s1533_s8 + $0x88] sm:$0xff] }
  0x1f   :  { %917 = vmatpush3.bf16.msra.mxu1 %v916_v5  ;;  %v972_v51 = vpack.c.bf16 %v438_v50, %v435_v49  ;;  %v975_v55 = vpack.c.bf16 %v444_v54, %v441_v53  ;;  %v447_v56 = vld [vmem:[%s1533_s8 + $0xa0] sm:$0xff]  ;;  %v450_v57 = vld [vmem:[%s1533_s8 + $0xb8] sm:$0xff]  ;;  %v453_v59 = vld [vmem:[%s1533_s8 + $0xd0] sm:$0xff] }
  0x20   :  { %918 = vmatprep.subr.bf16.mxu1 %v1061_v7  ;;  %v978_v58 = vpack.c.bf16 %v450_v57, %v447_v56  ;;  %v456_v60 = vld [vmem:[%s1533_s8 + $0xe8] sm:$0xff]  ;;  %v459_v62 = vld [vmem:[%s1533_s8 + $0x100] sm:$0xff]  ;;  %v462_v63 = vld [vmem:[%s1533_s8 + $0x118] sm:$0xff] }
  0x21   :  { %898 = vmatpush3.bf16.msra.mxu0 %v897_v4  ;;  %v981_v61 = vpack.c.bf16 %v456_v60, %v453_v59  ;;  %v984_v0 = vpack.c.bf16 %v462_v63, %v459_v62  ;;  %v465_v1 = vld [vmem:[%s1533_s8 + $0x130] sm:$0xff]  ;;  %v468_v2 = vld [vmem:[%s1533_s8 + $0x148] sm:$0xff]  ;;  %v332_v4 = vld [vmem:[%s1526_s1] sm:$0xff] }
  0x22   :  { %933 = vmatprep.subr.bf16.mxu0 %v1061_v7  ;;  %v987_v3 = vpack.c.bf16 %v468_v2, %v465_v1  ;;  %v427_v5 = vld [vmem:[%s1533_s8] sm:$0xff]  ;;  %v430_v6 = vld [vmem:[%s1533_s8 + $0x18] sm:$0xff]  ;;  %v433_v15 = vld [vmem:[%s1533_s8 + $0x30] sm:$0xff] }
  0x23   :  { %920 = vmatpush3.bf16.msra.mxu1 %v919_v10  ;;  %v938_v11 = vpack.c.bf16 %v430_v6, %v427_v5  ;;  %v436_v16 = vld [vmem:[%s1533_s8 + $0x48] sm:$0xff]  ;;  %v443_v18 = vld [vmem:[%s1533_s8 + $0x80] sm:$0xff]  ;;  %v442_v22 = vld [vmem:[%s1533_s8 + $0x78] sm:$0xff] }
  0x24   :  { %160 = vmatmul.mubr.f32.vlgmr.msra.gmra.mrb[0].mxu0 %v39_v9  ;;  %921 = vmatprep.subr.bf16.mxu1 %v1061_v7  ;;  %v434_v9 = vld [vmem:[%s1533_s8 + $0x38] sm:$0xff]  ;;  %v942_v19 = vpack.c.bf16 %v436_v16, %v433_v15  ;;  %v439_v21 = vld [vmem:[%s1533_s8 + $0x60] sm:$0xff]  ;;  %v469_v50 = vld [vmem:[%s1533_s8 + $0x150] sm:$0xff] }
  0x25   :  { %829 = vmatprep.mubr.msk.f32.mxu0 %vm1062_vm0, %v1063_v13  ;;  %935 = vmatpush3.bf16.msra.mxu0 %v934_v35  ;;  %v454_v33 = vld [vmem:[%s1533_s8 + $0xd8] sm:$0xff]  ;;  %v461_v35 = vld [vmem:[%s1533_s8 + $0x110] sm:$0xff]  ;;  %v463_v44 = vld [vmem:[%s1533_s8 + $0x120] sm:$0xff] }
  0x26   :  { %827 = vmatprep.subr.mxu0 %v1063_v13  ;;  %v458_v34 = vld [vmem:[%s1533_s8 + $0xf8] sm:$0xff]  ;;  %v687_v56 = vld [vmem:[%s1532_s7] ss:$0 sm:$0xff] }
  0x27   :  { %923 = vmatpush3.bf16.msra.mxu1 %v922_v14  ;;  %v470_v47 = vld [vmem:[%s1533_s8 + $0x158] sm:$0xff] }
  0x28   :  { %924 = vmatprep.subr.bf16.mxu1 %v1061_v7  ;;  %v474_v54 = vld [vmem:[%s1533_s8 + $0x178] sm:$0xff] }
  0x29   :  { %828 = vmatpush3.msk.msra.mxu0 %vm91_vm1, %v341_v42 }
  0x2a   :  { %937 = vmatprep.subr.bf16.mxu0 %v936_v45  ;;  %v466_v45 = vld [vmem:[%s1533_s8 + $0x138] sm:$0xff] }
  0x2b   :  { %926 = vmatpush3.bf16.msra.mxu1 %v925_v17  ;;  %v440_v17 = vld [vmem:[%s1533_s8 + $0x68] sm:$0xff]  ;;  %v962_v46 = vpack.c.bf16 %v466_v45, %v463_v44 }
  0x2c   :  { %927 = vmatprep.subr.bf16.mxu1 %v1061_v7 }
  0x2f   :  { %929 = vmatpush3.bf16.msra.mxu1 %v928_v20  ;;  %v944_v20 = vpack.c.bf16 %v443_v18, %v440_v17 }
  0x30   :  { %930 = vmatprep.subr.bf16.mxu1 %v1061_v7 }
  0x33   :  { %932 = vmatpush3.bf16.msra.mxu1 %v931_v23  ;;  %v446_v23 = vld [vmem:[%s1533_s8 + $0x98] sm:$0xff] }
  0x34   :  { %968 = vmatprep.subr.bf16.mxu1 %v1061_v7 }
  0xe9   :  { %v231_v24 = vpop.f32.mrb[0].mxu1 }
  0xea   :  { %v787_v25 = vpop.f32.mrb[1].mxu1 }
  0xf7   :  { %v725_v26 = vpop.f32.mrb[0].mxu0 }
  0xf8   :  { %v726_v27 = vpop.f32.mrb[1].mxu0 }
  0xf9   :  { %v727_v29 = vadd.f32 %v726_v27, %v725_v26  ;;  %v445_v26 = vld [vmem:[%s1533_s8 + $0x90] sm:$0xff]  ;;  %v448_v27 = vld [vmem:[%s1533_s8 + $0xa8] sm:$0xff] }
  0xfb   :  { %v162_v30 = vadd.f32 %v727_v29, %v683_v28  ;;  %v452_v28 = vld [vmem:[%s1533_s8 + $0xc8] sm:$0xff]  ;;  %v455_v29 = vld [vmem:[%s1533_s8 + $0xe0] sm:$0xff] }
  0xfd   :  { %v232_v31 = vadd.f32 %v231_v24, %v162_v30  ;;  %v449_v24 = vld [vmem:[%s1533_s8 + $0xb0] sm:$0xff]  ;;  %v950_v30 = vpack.c.bf16 %v448_v27, %v445_v26 }
  0xfe   :  { %v948_v25 = vpack.c.bf16 %v449_v24, %v446_v23 }
  0xff   :  { %v235_v32 = vmax.f32 %v232_v31, 0.0  ;;  %v952_v31 = vpack.c.bf16 %v455_v29, %v452_v28 }
 0x101   :  { %821 = vmatmul.mubr.f32.vlgmr.msra.gmra.mrb[2].mxu1 %v235_v32  ;;  %v451_v32 = vld [vmem:[%s1533_s8 + $0xc0] sm:$0xff] }
 0x102   :  { %864 = vmatprep.mubr.msk.f32.mxu1 %vm1062_vm0, %v1063_v13  ;;  %970 = vmatpush3.bf16.msra.mxu1 %v969_v48  ;;  %v473_v48 = vld [vmem:[%s1533_s8 + $0x170] sm:$0xff] }
 0x103   :  { %971 = vmatprep.subr.bf16.mxu1 %v1061_v7  ;;  %v964_v49 = vpack.c.bf16 %v473_v48, %v470_v47 }
 0x106   :  { %973 = vmatpush3.bf16.msra.mxu1 %v972_v51  ;;  %v472_v51 = vld [vmem:[%s1533_s8 + $0x168] sm:$0xff] }
 0x107   :  { %974 = vmatprep.subr.bf16.mxu1 %v1061_v7  ;;  %v966_v53 = vpack.c.bf16 %v472_v51, %v469_v50 }
 0x10a   :  { %976 = vmatpush3.bf16.msra.mxu1 %v975_v55 }
 0x10b   :  { %977 = vmatprep.subr.bf16.mxu1 %v1061_v7 }
 0x10e   :  { %979 = vmatpush3.bf16.msra.mxu1 %v978_v58 }
 0x10f   :  { %980 = vmatprep.subr.bf16.mxu1 %v1061_v7 }
 0x112   :  { %982 = vmatpush3.bf16.msra.mxu1 %v981_v61 }
 0x113   :  { %983 = vmatprep.subr.bf16.mxu1 %v1061_v7 }
 0x116   :  { %985 = vmatpush3.bf16.msra.mxu1 %v984_v0 }
 0x117   :  { %986 = vmatprep.subr.bf16.mxu1 %v1061_v7 }
 0x11a   :  { %988 = vmatpush3.bf16.msra.mxu1 %v987_v3 }
 0x11b   :  { %989 = vmatprep.subr.bf16.mxu1 %v1061_v7  ;;  %v437_v7 = vld [vmem:[%s1533_s8 + $0x50] sm:$0xff] }
 0x11c   :  { %v940_v14 = vpack.c.bf16 %v437_v7, %v434_v9 }
 0x1d4   :  { %v325_v37 = vpop.f32.mrb[2].mxu1 }
 0x1d5   :  { %v326_v38 = vadd.f32 %v686_v36, %v325_v37  ;;  %v822_v39 = vpop.f32.mrb[3].mxu1  ;;  %v954_v36 = vpack.c.bf16 %v454_v33, %v451_v32  ;;  %v956_v37 = vpack.c.bf16 %v461_v35, %v458_v34 }
 0x1d6   :  { %v460_v39 = vld [vmem:[%s1533_s8 + $0x108] sm:$0xff] }
 0x1d7   :  { %v329_v40 = vmul.f32 1e-05, %v326_v38  ;;  %654 = vst [vmem:[#allocation4] sm:$0xff] %v326_v38 }
 0x1d9   :  { %v330_v41 = vmul.f32 1.442695, %v329_v40  ;;  %v464_v40 = vld [vmem:[%s1533_s8 + $0x128] sm:$0xff] }
 0x1db   :  { %999 = vpow2.f32 %v330_v41  ;;  %v467_v41 = vld [vmem:[%s1533_s8 + $0x140] sm:$0xff] }
 0x1dc   :  { %v960_v43 = vpack.c.bf16 %v467_v41, %v464_v40 }
 0x1e5   :  { %v1000_v52 = vpop.eup %999 }
 0x1e6   :  { %334 = vrot.lane.b32.xlu0 %v1000_v52, %s1065_s12  ;;  %v471_v52 = vld [vmem:[%s1533_s8 + $0x160] sm:$0xff] }
 0x1e7   :  { %v990_v55 = vpack.c.bf16 %v474_v54, %v471_v52 }
 0x1e9   :  { %991 = vmatpush3.bf16.msra.mxu1 %v990_v55 }
 0x258   :  { %v335_v8 = vpop.permute.xlu0 %334 }
 0x259   :  { %v337_v10 = vmul.f32 %v335_v8, %v332_v4 }
 0x25b   :  { %v338_v12 = vadd.f32 %v337_v10, %v326_v38  ;;  %v457_v38 = vld [vmem:[%s1533_s8 + $0xf0] sm:$0xff] }
 0x25c   :  { %v958_v42 = vpack.c.bf16 %v460_v39, %v457_v38 }
 0x25d   :  { %830 = vmatmul.mubr.msk.f32.vlgmr.msra.gmra.mrb[2].mxu0 %vm349_vm5, %v338_v12 }
 0x25e   :  { %939 = vmatpush1.bf16.msra.mxu0 %v938_v11  ;;  %556 = vmatprep.mubr.f32.mxu0 %v1063_v13  ;;  %v946_v13 = vpack.c.bf16 %v442_v22, %v439_v21 }
 0x25f   :  { %941 = vmatprep.subr.bf16.mxu0 %v940_v14 }
 0x262   :  { %943 = vmatpush1.bf16.msra.mxu0 %v942_v19 }
 0x263   :  { %945 = vmatprep.subr.bf16.mxu0 %v944_v20 }
 0x266   :  { %947 = vmatpush1.bf16.msra.mxu0 %v946_v13 }
 0x267   :  { %949 = vmatprep.subr.bf16.mxu0 %v948_v25 }
 0x26a   :  { %951 = vmatpush1.bf16.msra.mxu0 %v950_v30 }
 0x26b   :  { %953 = vmatprep.subr.bf16.mxu0 %v952_v31 }
 0x26e   :  { %955 = vmatpush1.bf16.msra.mxu0 %v954_v36 }
 0x26f   :  { %957 = vmatprep.subr.bf16.mxu0 %v956_v37 }
 0x272   :  { %959 = vmatpush1.bf16.msra.mxu0 %v958_v42 }
 0x273   :  { %961 = vmatprep.subr.bf16.mxu0 %v960_v43 }
 0x276   :  { %963 = vmatpush1.bf16.msra.mxu0 %v962_v46 }
 0x277   :  { %965 = vmatprep.subr.bf16.mxu0 %v964_v49 }
 0x27a   :  { %967 = vmatpush1.bf16.msra.mxu0 %v966_v53 }
 0x330   :  { %v422_v57 = vpop.f32.mrb[2].mxu0 }
 0x331   :  { %v423_v58 = vadd.f32 %v687_v56, %v422_v57  ;;  %v831_v59 = vpop.f32.mrb[3].mxu0 }
 0x333   :  { %v426_v60 = vmax.f32 %v423_v58, 0.0 }
 0x335   :  { %557 = vmatmul.mubr.f32.vlgmr.msra.gmra.mrb[4].mxu0 %v426_v60  ;;  %865 = vmatmul.mubr.f32.vlgmr.msra.gmra.mrb[4].mxu1 %v426_v60 }
 0x336   :  { %1024 = shalt.err (!%p1021_p4)
}
 0x337   :  { %s1025_s7 = scalar_lea.hbm %s1536_s11, 128 }
 0x338   :  { %p1026_p5 = scmp.ne.s32.totalorder %s1536_s11, %s1025_s7  ;;  %p1029_p6 = scmp.lt.u32.totalorder %s1025_s7, %s1536_s11 }
 0x33a   :  { %p1031_p7 = pnand %p1029_p6, %p1026_p5 }
 0x33c   :  { %1034 = shalt.err (!%p1031_p7)
}
 0x33d   :  { %674 = dma.vmem_to_hbm [thread:$0]  %s672_s21, 128, %s1536_s11, [#allocation5]   ;;  %v477_v61 = vlaneseq  ;;  %v475_v1 = vld [vmem:[%s1534_s9] sm:$0x7] }
 0x33e   :  { %s1067_s9 = smov [#allocation2]  }
 0x33f   :  { %v478_v62 = vshrl.u32 %v477_v61, 7  ;;  %s661_s11 = sshll.u32 %s1067_s9, 4  ;;  %s662_s11 = int_to_ptr.vmem [resolvable:$true] %s661_s11 }
 0x340   :  { %s1035_s29 = scalar_lea.vmem %s662_s11, 384  ;;  %p1040_p9 = scmp.lt.s32.totalorder %s662_s11, %s662_s11 }
 0x341   :  { %v479_v63 = vsub.s32 0, %v478_v62  ;;  %v487_v0 = vsub.s32 2, %v478_v62  ;;  %v483_v2 = vsub.s32 1, %v478_v62  ;;  %p1036_p8 = scmp.ne.s32.totalorder %s662_s11, %s1035_s29  ;;  %p1041_p10 = scmp.lt.s32.totalorder %s1035_s29, %s1035_s29 }
 0x343   :  { %v480_v3 = vrot.slane %v475_v1, %v479_v63  ;;  %v488_v4 = vrot.slane %v475_v1, %v487_v0  ;;  %v484_v5 = vrot.slane %v475_v1, %v483_v2  ;;  %p1042_p11 = por %p1041_p10, %p1040_p9 }
 0x345   :  { %p1043_p12 = pnand %p1042_p11, %p1036_p8 }
 0x408   :  { %v558_v6 = vpop.f32.mrb[4].mxu0  ;;  %v629_v8 = vpop.f32.mrb[4].mxu1 }
 0x409   :  { %v559_v9 = vadd.f32 %v558_v6, %v480_v3  ;;  %v630_v7 = vadd.f32 %v629_v8, %v488_v4  ;;  %v560_v10 = vpop.f32.mrb[5].mxu0  ;;  %v866_v11 = vpop.f32.mrb[5].mxu1 }
 0x40a   :  { %v561_v12 = vadd.f32 %v560_v10, %v484_v5 }
 0x40b   :  { %v690_v14 = vmul.f32 -1.442695, %v559_v9  ;;  %v692_v15 = vmul.f32 -1.442695, %v630_v7 }
 0x40c   :  { %v691_v16 = vmul.f32 -1.442695, %v561_v12 }
 0x40d   :  { %1001 = vpow2.f32 %v690_v14 }
 0x40e   :  { %1003 = vpow2.f32 %v692_v15 }
 0x40f   :  { %1005 = vpow2.f32 %v691_v16 }
 0x417   :  { %v1002_v17 = vpop.eup %1001 }
 0x418   :  { %v1004_v18 = vpop.eup %1003  ;;  %v642_v19 = vadd.f32 1.0, %v1002_v17 }
 0x419   :  { %v1006_v20 = vpop.eup %1005  ;;  %v644_v21 = vadd.f32 1.0, %v1004_v18 }
 0x41a   :  { %1007 = vrcp.f32 %v642_v19  ;;  %v643_v22 = vadd.f32 1.0, %v1006_v20 }
 0x41b   :  { %1009 = vrcp.f32 %v644_v21 }
 0x41c   :  { %1011 = vrcp.f32 %v643_v22 }
 0x424   :  { %v1008_v23 = vpop.eup %1007 }
 0x425   :  { %v1010_v24 = vpop.eup %1009  ;;  %651 = vst [vmem:[#allocation2] sm:$0xff] %v1008_v23 }
 0x426   :  { %v1012_v13 = vpop.eup %1011  ;;  %653 = vst.msk [vmem:[#allocation2 + $0x10] sm:$0xff] %vm87_vm4, %v1010_v24 }
 0x427   :  { %652 = vst [vmem:[#allocation2 + $0x8] sm:$0xff] %v1012_v13 }
 0x428   :  { %1046 = shalt.err (!%p1043_p12)
}
 0x429   :  { %s1047_s13 = scalar_lea.hbm %s1535_s10, 384 }
 0x42a   :  { %p1048_p13 = scmp.ne.s32.totalorder %s1535_s10, %s1047_s13  ;;  %p1051_p0 = scmp.lt.u32.totalorder %s1047_s13, %s1535_s10 }
 0x42c   :  { %p1053_p1 = pnand %p1051_p0, %p1048_p13 }
 0x42e   :  { %1056 = shalt.err (!%p1053_p1)
}
 0x42f   :  { %664 = dma.vmem_to_hbm [thread:$0]  %s662_s11, 384, %s1535_s10, [#allocation3]  }
 0x430   :  { %1057 = dma.done.wait [#allocation3], 384  }
 0x431   :  { %1058 = vsyncadd [#allocation3], 4294966912 }
 0x432   :  { %1059 = dma.done.wait [#allocation5], 128  }
 0x433   :  { %1060 = vsyncadd [#allocation5], 4294967168 }
 0x434   :  { %681 = vsyncpa [#allocation3], 1 }
 0x435   :  { %682 = vsyncpa [#allocation5], 1 }

</bundles_post_ra>
